<compile_context>
chip_gen: v6e
topology: v6e:2x2x1
jax: 0.10.0
libtpu: 0.0.40
codegen_flags: <defaults>
</compile_context>

<pallas_src>
import numpy as np
import jax
import jax.numpy as jnp
from jax.experimental import pallas as pl
from jax.experimental.pallas import tpu as pltpu

NEG_SLOPE = 0.01                               # nn.LeakyReLU() default
_VMEM_LIMIT_BYTES = 56 * 1024 * 1024           # headroom under v7x's 64 MiB
_CPARAMS = pltpu.CompilerParams(
    dimension_semantics=("parallel",),         # lane-tile axis -> both v7x TCs
    vmem_limit_bytes=_VMEM_LIMIT_BYTES)


# --------------------------------------------------------------------------
# In-kernel helpers
# --------------------------------------------------------------------------
def _leaky(y):
    return jnp.where(y > 0, y, NEG_SLOPE * y)


def _edge_masks(tile, blk):
    """Boolean (1, tile) masks for the current lane tile: True where a left /
    right neighbour stays inside the same per-batch block (generated in-kernel
    with iota, no HBM mask constants)."""
    idx = (jax.lax.broadcasted_iota(jnp.int32, (1, tile), 1)
           + pl.program_id(0) * tile)
    pos = idx % blk
    return pos != 0, pos != (blk - 1)


def _shift_r(x, ok):
    """out[:, m] = x[:, m-1]; zeroed (via select, v5e-safe) at block edges."""
    r = pltpu.roll(x, 1, 1)
    return jnp.where(ok, r, jnp.zeros_like(r))


def _shift_l(x, ok):
    """out[:, m] = x[:, m+1]; zeroed (via select, v5e-safe) at block edges."""
    r = pltpu.roll(x, x.shape[1] - 1, 1)
    return jnp.where(ok, r, jnp.zeros_like(r))


# --------------------------------------------------------------------------
# Pallas kernels (one per UNet level)
# --------------------------------------------------------------------------
def make_down_kernel(blk, tile):
    """Polyphase Conv1d(k=3,p=1)+LeakyReLU emitting the bridge as two phase
    halves and the fused max_pool1d(2) as max(even, odd) (no compaction)."""
    def kernel(xe_ref, xo_ref, w0_ref, w1_ref, w2_ref, b_ref,
               bre_ref, bro_ref, pool_ref):
        ml, mr = _edge_masks(tile, blk)
        xe, xo = xe_ref[...], xo_ref[...]
        w0, w1, w2 = w0_ref[...], w1_ref[...], w2_ref[...]
        b = b_ref[...]
        f32 = jnp.float32
        xo_m1 = _shift_r(xo, ml)               # x[2m-1]
        xe_p1 = _shift_l(xe, mr)               # x[2m+2]
        # y[2m]   = W0 x[2m-1] + W1 x[2m]   + W2 x[2m+1]
        # y[2m+1] = W0 x[2m]   + W1 x[2m+1] + W2 x[2m+2]
        ye = (jnp.dot(w0, xo_m1, preferred_element_type=f32)
              + jnp.dot(w1, xe, preferred_element_type=f32)
              + jnp.dot(w2, xo, preferred_element_type=f32) + b)
        yo = (jnp.dot(w0, xe, preferred_element_type=f32)
              + jnp.dot(w1, xo, preferred_element_type=f32)
              + jnp.dot(w2, xe_p1, preferred_element_type=f32) + b)
        ye = _leaky(ye)
        yo = _leaky(yo)
        bre_ref[...] = ye.astype(bre_ref.dtype)
        bro_ref[...] = yo.astype(bro_ref.dtype)
        # max_pool1d(kernel=2, stride=2) == max over the two phases (f32 VPU).
        pool_ref[...] = jnp.maximum(ye, yo).astype(pool_ref.dtype)
    return kernel


def make_up_kernel(blk, tile, pre, last, cdt):
    """Fused up block, all in phase form:
       [optional deepest Conv1d(k=3,p=1)+LeakyReLU]  ->
       ConvTranspose1d(k=3,s=2,p=1,op=1)+LeakyReLU (emits both phases) ->
       channel-concat with the phase-form bridge + Conv1d(k=3,p=1)+LeakyReLU
       (polyphase, accumulated dots, no sublane concat) ->
       [optional final Conv1d(k=1)]."""
    def kernel(*refs):
        it = iter(refs)
        a_ref, bre_ref, bro_ref = next(it), next(it), next(it)
        if pre:
            pw0, pw1, pw2, pb = next(it), next(it), next(it), next(it)
        tw0, tw1, tw2, tb = next(it), next(it), next(it), next(it)
        cw0u, cw0b = next(it), next(it)
        cw1u, cw1b = next(it), next(it)
        cw2u, cw2b = next(it), next(it)
        cb = next(it)
        if last:
            lw, lb = next(it), next(it)
        oute_ref, outo_ref = next(it), next(it)

        ml, mr = _edge_masks(tile, blk)
        f32 = jnp.float32
        a = a_ref[...]
        if pre:
            # Deepest down-level Conv1d(k=3,p=1) + LeakyReLU (dense), fused in.
            aa = (jnp.dot(pw0[...], _shift_r(a, ml), preferred_element_type=f32)
                  + jnp.dot(pw1[...], a, preferred_element_type=f32)
                  + jnp.dot(pw2[...], _shift_l(a, mr), preferred_element_type=f32)
                  + pb[...])
            a = _leaky(aa).astype(cdt)
        # ConvTranspose1d(k=3, stride=2, pad=1, output_pad=1):
        #   out[2q]   = W1^T x[q]
        #   out[2q+1] = W2^T x[q] + W0^T x[q+1]
        a_p1 = _shift_l(a, mr)
        up_e = jnp.dot(tw1[...], a, preferred_element_type=f32) + tb[...]
        up_o = (jnp.dot(tw2[...], a, preferred_element_type=f32)
                + jnp.dot(tw0[...], a_p1, preferred_element_type=f32) + tb[...])
        up_e = _leaky(up_e).astype(cdt)
        up_o = _leaky(up_o).astype(cdt)
        br_e, br_o = bre_ref[...], bro_ref[...]
        # Conv1d(k=3,p=1) over concat([up, bridge], channels) in polyphase
        # form: accumulated small dots (no sublane concat, no interleave).
        up_o_m1 = _shift_r(up_o, ml)
        br_o_m1 = _shift_r(br_o, ml)
        up_e_p1 = _shift_l(up_e, mr)
        br_e_p1 = _shift_l(br_e, mr)
        oe = (jnp.dot(cw0u[...], up_o_m1, preferred_element_type=f32)
              + jnp.dot(cw0b[...], br_o_m1, preferred_element_type=f32)
              + jnp.dot(cw1u[...], up_e, preferred_element_type=f32)
              + jnp.dot(cw1b[...], br_e, preferred_element_type=f32)
              + jnp.dot(cw2u[...], up_o, preferred_element_type=f32)
              + jnp.dot(cw2b[...], br_o, preferred_element_type=f32)
              + cb[...])
        oo = (jnp.dot(cw0u[...], up_e, preferred_element_type=f32)
              + jnp.dot(cw0b[...], br_e, preferred_element_type=f32)
              + jnp.dot(cw1u[...], up_o, preferred_element_type=f32)
              + jnp.dot(cw1b[...], br_o, preferred_element_type=f32)
              + jnp.dot(cw2u[...], up_e_p1, preferred_element_type=f32)
              + jnp.dot(cw2b[...], br_e_p1, preferred_element_type=f32)
              + cb[...])
        oe = _leaky(oe)
        oo = _leaky(oo)
        if last:
            # Final Conv1d(k=1) fused into the epilogue (f32, no activation).
            oe = jnp.dot(lw[...], oe, preferred_element_type=f32) + lb[...]
            oo = jnp.dot(lw[...], oo, preferred_element_type=f32) + lb[...]
        oute_ref[...] = oe.astype(oute_ref.dtype)
        outo_ref[...] = oo.astype(outo_ref.dtype)
    return kernel


# --------------------------------------------------------------------------
# Host-side tiling / spec helpers and O(S) XLA layout glue
# --------------------------------------------------------------------------
def _choose_tile(n_blocks, blk, target):
    """Pick a lane tile that is a whole number of per-batch blocks and either
    a multiple of 128 lanes or the full extent (Pallas lane constraint)."""
    total = n_blocks * blk
    for per in range(1, n_blocks + 1):
        if n_blocks % per:
            continue
        lanes = per * blk
        if lanes % 128 != 0 and lanes != total:
            continue
        if lanes >= min(target, total):
            return lanes
    return total


def _act_spec(rows, tile):
    return pl.BlockSpec((rows, tile), lambda t: (0, t))


def _const_spec(arr):
    # TODO(synk): pipeline_mode=pl.Buffered(1) to single-buffer these
    #             constant-index blocks once the lane grid has >1 step.
    return pl.BlockSpec(arr.shape, lambda t: (0, 0))


def _deinterleave(x, n_blocks):
    """(C, n*blk) -> even/odd phases (C, n*blk/2) each, per batch block."""
    c, s = x.shape
    blk = s // n_blocks
    x4 = x.reshape(c, n_blocks, blk // 2, 2)
    return x4[..., 0].reshape(c, s // 2), x4[..., 1].reshape(c, s // 2)


def _interleave(xe, xo, n_blocks):
    """Inverse of _deinterleave."""
    c, sh = xe.shape
    half = sh // n_blocks
    y = jnp.stack([xe.reshape(c, n_blocks, half),
                   xo.reshape(c, n_blocks, half)], axis=-1)
    return y.reshape(c, 2 * sh)


# --------------------------------------------------------------------------
# Per-level wrappers
# --------------------------------------------------------------------------
def down_level(xe, xo, pk, n_batch, blk, *, lane_tile, compute_dtype):
    cin, sh = xe.shape
    cout = pk["w0"].shape[0]
    tile = _choose_tile(n_batch, blk, lane_tile)
    grid = (sh // tile,)
    args = (xe, xo, pk["w0"], pk["w1"], pk["w2"], pk["b"])
    in_specs = ([_act_spec(cin, tile), _act_spec(cin, tile)]
                + [_const_spec(a) for a in args[2:]])
    out_specs = (_act_spec(cout, tile),) * 3
    out_shape = (jax.ShapeDtypeStruct((cout, sh), compute_dtype),) * 3
    return pl.pallas_call(
        make_down_kernel(blk, tile), grid=grid,
        in_specs=in_specs, out_specs=out_specs, out_shape=out_shape,
        compiler_params=_CPARAMS,
    )(*args)


def up_level(a, br_e, br_o, pk, n_batch, blk, *, pre, last, lane_tile,
             compute_dtype):
    ca, s = a.shape
    cb = br_e.shape[0]
    tile = _choose_tile(n_batch, blk, lane_tile)
    grid = (s // tile,)
    args = [a, br_e, br_o]
    if pre:
        args += [pk["pw0"], pk["pw1"], pk["pw2"], pk["pb"]]
    args += [pk["tw0"], pk["tw1"], pk["tw2"], pk["tb"],
             pk["cw0u"], pk["cw0b"], pk["cw1u"], pk["cw1b"],
             pk["cw2u"], pk["cw2b"], pk["cb"]]
    if last:
        args += [pk["lw"], pk["lb"]]
    in_specs = ([_act_spec(ca, tile), _act_spec(cb, tile), _act_spec(cb, tile)]
                + [_const_spec(x) for x in args[3:]])
    c_out = pk["lw"].shape[0] if last else pk["tw1"].shape[0]
    odt = jnp.float32 if last else compute_dtype
    out_specs = (_act_spec(c_out, tile),) * 2
    out_shape = (jax.ShapeDtypeStruct((c_out, s), odt),) * 2
    return pl.pallas_call(
        make_up_kernel(blk, tile, pre, last, compute_dtype), grid=grid,
        in_specs=in_specs, out_specs=out_specs, out_shape=out_shape,
        compiler_params=_CPARAMS,
    )(*args)


# --------------------------------------------------------------------------
# Parameter construction (PyTorch layout) and one-time packing
# --------------------------------------------------------------------------
def init_params(key, in_channels, n_classes, depth, wf):
    def nrm(k, shape):
        return jax.random.normal(k, shape, jnp.float32) * 0.1

    params = {"down": [], "up": [], "last": None}
    keys = iter(jax.random.split(key, 64))
    prev = in_channels
    for i in range(depth):
        cout = 2 ** (wf + i)
        params["down"].append({"w": nrm(next(keys), (cout, prev, 3)),
                               "b": nrm(next(keys), (cout,))})
        prev = cout
    for i in reversed(range(depth - 1)):
        cout = 2 ** (wf + i)
        params["up"].append({
            "wT": nrm(next(keys), (prev, cout, 3)),   # ConvTranspose1d weight
            "bT": nrm(next(keys), (cout,)),
            "wc": nrm(next(keys), (cout, prev, 3)),   # Conv1d(prev -> cout)
            "bc": nrm(next(keys), (cout,)),
        })
        prev = cout
    params["last"] = {"w": nrm(next(keys), (n_classes, prev, 1)),
                      "b": nrm(next(keys), (n_classes,))}
    return params


def pack_params(params, depth, compute_dtype=jnp.bfloat16):
    """One-time weight packing / casting (no per-forward transposes)."""
    cdt = compute_dtype
    packed = {"down": [], "up": [], "dtype": cdt}
    for i in range(depth - 1):
        w, b = params["down"][i]["w"], params["down"][i]["b"]
        packed["down"].append({
            "w0": w[:, :, 0].astype(cdt), "w1": w[:, :, 1].astype(cdt),
            "w2": w[:, :, 2].astype(cdt),
            "b": b.reshape(-1, 1).astype(jnp.float32)})
    wdeep = params["down"][depth - 1]["w"]
    bdeep = params["down"][depth - 1]["b"]
    for j in range(depth - 1):
        up = params["up"][j]
        wT, wc = up["wT"], up["wc"]
        cout = wT.shape[1]
        d = {
            "tw0": wT[:, :, 0].T.astype(cdt), "tw1": wT[:, :, 1].T.astype(cdt),
            "tw2": wT[:, :, 2].T.astype(cdt),
            "tb": up["bT"].reshape(-1, 1).astype(jnp.float32),
            "cw0u": wc[:, :cout, 0].astype(cdt), "cw0b": wc[:, cout:, 0].astype(cdt),
            "cw1u": wc[:, :cout, 1].astype(cdt), "cw1b": wc[:, cout:, 1].astype(cdt),
            "cw2u": wc[:, :cout, 2].astype(cdt), "cw2b": wc[:, cout:, 2].astype(cdt),
            "cb": up["bc"].reshape(-1, 1).astype(jnp.float32),
        }
        if j == 0:   # deepest down conv fused into the first up kernel
            d.update({"pw0": wdeep[:, :, 0].astype(cdt),
                      "pw1": wdeep[:, :, 1].astype(cdt),
                      "pw2": wdeep[:, :, 2].astype(cdt),
                      "pb": bdeep.reshape(-1, 1).astype(jnp.float32)})
        if j == depth - 2:   # final 1x1 conv fused into the last up kernel
            d.update({"lw": params["last"]["w"][:, :, 0].astype(jnp.float32),
                      "lb": params["last"]["b"].reshape(-1, 1).astype(jnp.float32)})
        packed["up"].append(d)
    return packed


# --------------------------------------------------------------------------
# UNet forward (phase layout; one layout transform in, one out)
# --------------------------------------------------------------------------
def unet_forward(packed, x, depth, *, lane_tile=1024):
    cdt = packed["dtype"]
    n, cin, length = x.shape
    assert depth >= 2, "this implementation fuses the deepest level into up[0]"
    assert length % (2 ** (depth - 1)) == 0, "L must be divisible by 2**(depth-1)"

    xt = jnp.transpose(x, (1, 0, 2)).reshape(cin, n * length)
    xe, xo = _deinterleave(xt, n)
    xe, xo = xe.astype(cdt), xo.astype(cdt)
    blk = length // 2                      # per-batch lanes of the phase domain
    bridges = []
    a = None
    a_blk = None
    for i in range(depth - 1):
        br_e, br_o, pooled = down_level(xe, xo, packed["down"][i], n, blk,
                                        lane_tile=lane_tile, compute_dtype=cdt)
        bridges.append((br_e, br_o))
        if i < depth - 2:
            xe, xo = _deinterleave(pooled, n)   # O(S) XLA glue, downsampled
            blk //= 2
        else:
            a, a_blk = pooled, blk              # dense input to the up path
    fin_e = fin_o = None
    for j in range(depth - 1):
        br_e, br_o = bridges[-1 - j]
        oe, oo = up_level(a, br_e, br_o, packed["up"][j], n, a_blk,
                          pre=(j == 0), last=(j == depth - 2),
                          lane_tile=lane_tile, compute_dtype=cdt)
        if j < depth - 2:
            a = _interleave(oe, oo, n)          # O(S) XLA glue
            a_blk *= 2
        else:
            fin_e, fin_o = oe, oo
    nclass = fin_e.shape[0]
    out = _interleave(fin_e, fin_o, n)          # (nclass, N*L) f32
    return jnp.transpose(out.reshape(nclass, n, length), (1, 0, 2))


# --------------------------------------------------------------------------
# Pure-JAX reference (correctness cross-check)
# --------------------------------------------------------------------------
def _ref_leaky(y):
    return jnp.where(y > 0, y, NEG_SLOPE * y)


def _ref_conv1d(x, w, b, pad):
    y = jax.lax.conv_general_dilated(
        x, w, window_strides=(1,), padding=((pad, pad),),
        dimension_numbers=("NCH", "OIH", "NCH"))
    return y + b[None, :, None]


def _ref_convT(x, w, b):
    wf = jnp.flip(w, axis=2).transpose(1, 0, 2)      # (Cout, Cin, 3)
    y = jax.lax.conv_general_dilated(
        x, wf, window_strides=(1,), padding=((1, 2),), lhs_dilation=(2,),
        dimension_numbers=("NCH", "OIH", "NCH"))
    return y + b[None, :, None]


def ref_forward(params, x, depth):
    blocks = []
    for i, p in enumerate(params["down"]):
        x = _ref_leaky(_ref_conv1d(x, p["w"], p["b"], 1))
        if i != depth - 1:
            blocks.append(x)
            nb, c, l = x.shape
            x = x.reshape(nb, c, l // 2, 2).max(-1)
    for i, p in enumerate(params["up"]):
        up = _ref_leaky(_ref_convT(x, p["wT"], p["bT"]))
        out = jnp.concatenate([up, blocks[-i - 1]], axis=1)
        x = _ref_leaky(_ref_conv1d(out, p["wc"], p["bc"], 1))
    return _ref_conv1d(x, params["last"]["w"], params["last"]["b"], 0)


# --------------------------------------------------------------------------
if __name__ == "__main__":
    in_channels, n_classes, depth, wf = 1, 2, 3, 3
    N, L = 2, 512

    key = jax.random.PRNGKey(0)
    kx, kp = jax.random.split(key)
    x = jax.random.normal(kx, (N, in_channels, L), jnp.float32)
    params = init_params(kp, in_channels, n_classes, depth, wf)

    ref = jax.block_until_ready(ref_forward(params, x, depth))

    # f32 path: strict check (lane_tile=256 exercises a multi-step parallel grid).
    packed_f32 = pack_params(params, depth, compute_dtype=jnp.float32)
    out = jax.block_until_ready(unet_forward(packed_f32, x, depth, lane_tile=256))
    assert out.shape == (N, n_classes, L), out.shape
    np.testing.assert_allclose(np.asarray(out), np.asarray(ref),
                               rtol=1e-4, atol=1e-4)

    # Default bf16 MXU-operand path (f32 accumulation / epilogue): loose check.
    packed_bf16 = pack_params(params, depth)      # compute_dtype=bf16 default
    out_bf16 = jax.block_until_ready(unet_forward(packed_bf16, x, depth,
                                                  lane_tile=256))
    np.testing.assert_allclose(np.asarray(out_bf16), np.asarray(ref),
                               rtol=1e-1, atol=1e-1)

    print("KERNEL_OK")
</pallas_src>

<mosaic_0001>
module attributes {stable_mosaic.version = 11 : i64} {
  func.func @kernel(%arg0: i32, %arg1: memref<1x256xf32, #tpu.memory_space<vmem>>, %arg2: memref<1x256xf32, #tpu.memory_space<vmem>>, %arg3: memref<8x1xf32, #tpu.memory_space<vmem>>, %arg4: memref<8x1xf32, #tpu.memory_space<vmem>>, %arg5: memref<8x1xf32, #tpu.memory_space<vmem>>, %arg6: memref<8x1xf32, #tpu.memory_space<vmem>>, %arg7: memref<8x256xf32, #tpu.memory_space<vmem>>, %arg8: memref<8x256xf32, #tpu.memory_space<vmem>>, %arg9: memref<8x256xf32, #tpu.memory_space<vmem>>) attributes {dimension_semantics = [#tpu.dimension_semantics<parallel>], iteration_bounds = array<i64: 2>, scalar_prefetch = 0 : i64, scratch_operands = 0 : i64, tpu.core_type = #tpu.core_type<tc>, window_params = [{transform_indices = @transform_0, window_bounds = array<i64: 1, 256>}, {transform_indices = @transform_1, window_bounds = array<i64: 1, 256>}, {pipeline_mode = #tpu.pipeline_mode<synchronous>, transform_indices = @transform_2, window_bounds = array<i64: 8, 1>}, {pipeline_mode = #tpu.pipeline_mode<synchronous>, transform_indices = @transform_3, window_bounds = array<i64: 8, 1>}, {pipeline_mode = #tpu.pipeline_mode<synchronous>, transform_indices = @transform_4, window_bounds = array<i64: 8, 1>}, {pipeline_mode = #tpu.pipeline_mode<synchronous>, transform_indices = @transform_5, window_bounds = array<i64: 8, 1>}, {transform_indices = @transform_6, window_bounds = array<i64: 8, 256>}, {transform_indices = @transform_7, window_bounds = array<i64: 8, 256>}, {transform_indices = @transform_8, window_bounds = array<i64: 8, 256>}]} {
    %0 = tpu.iota {dimensions = array<i32: 1>} : vector<1x256xi32>
    %c256_i32 = arith.constant 256 : i32
    %1 = arith.muli %arg0, %c256_i32 : i32
    %2 = vector.broadcast %1 : i32 to vector<1x256xi32>
    %3 = arith.addi %0, %2 : vector<1x256xi32>
    %c256_i32_0 = arith.constant 256 : i32
    %c0_i32 = arith.constant 0 : i32
    %4 = arith.cmpi eq, %c256_i32_0, %c0_i32 : i32
    %c1_i32 = arith.constant 1 : i32
    %5 = arith.select %4, %c1_i32, %c256_i32_0 : i32
    %6 = vector.broadcast %5 : i32 to vector<1x256xi32>
    %7 = arith.remsi %3, %6 : vector<1x256xi32>
    %c0_i32_1 = arith.constant 0 : i32
    %8 = vector.broadcast %c0_i32_1 : i32 to vector<1x256xi32>
    %9 = arith.cmpi ne, %7, %8 : vector<1x256xi32>
    %c0_i32_2 = arith.constant 0 : i32
    %10 = vector.broadcast %c0_i32_2 : i32 to vector<1x256xi32>
    %11 = arith.cmpi slt, %7, %10 : vector<1x256xi32>
    %c0_i32_3 = arith.constant 0 : i32
    %12 = arith.cmpi slt, %5, %c0_i32_3 : i32
    %13 = vector.broadcast %12 : i1 to vector<1x256xi1>
    %14 = vector.broadcast %13 : vector<1x256xi1> to vector<1x256xi1>
    %15 = arith.xori %11, %14 : vector<1x256xi1>
    %16 = arith.andi %15, %9 : vector<1x256xi1>
    %17 = vector.broadcast %5 : i32 to vector<1x256xi32>
    %18 = arith.addi %7, %17 : vector<1x256xi32>
    %19 = arith.select %16, %18, %7 : vector<1x256xi1>, vector<1x256xi32>
    %c0_i32_4 = arith.constant 0 : i32
    %20 = vector.broadcast %c0_i32_4 : i32 to vector<1x256xi32>
    %21 = arith.cmpi ne, %19, %20 : vector<1x256xi32>
    %c255_i32 = arith.constant 255 : i32
    %22 = vector.broadcast %c255_i32 : i32 to vector<1x256xi32>
    %23 = arith.cmpi ne, %19, %22 : vector<1x256xi32>
    %c0 = arith.constant 0 : index
    %c0_5 = arith.constant 0 : index
    %24 = vector.load %arg1[%c0, %c0_5] : memref<1x256xf32, #tpu.memory_space<vmem>>, vector<1x256xf32>
    %c0_6 = arith.constant 0 : index
    %c0_7 = arith.constant 0 : index
    %25 = vector.load %arg2[%c0_6, %c0_7] : memref<1x256xf32, #tpu.memory_space<vmem>>, vector<1x256xf32>
    %c0_8 = arith.constant 0 : index
    %c0_9 = arith.constant 0 : index
    %26 = vector.load %arg3[%c0_8, %c0_9] : memref<8x1xf32, #tpu.memory_space<vmem>>, vector<8x1xf32>
    %c0_10 = arith.constant 0 : index
    %c0_11 = arith.constant 0 : index
    %27 = vector.load %arg4[%c0_10, %c0_11] : memref<8x1xf32, #tpu.memory_space<vmem>>, vector<8x1xf32>
    %c0_12 = arith.constant 0 : index
    %c0_13 = arith.constant 0 : index
    %28 = vector.load %arg5[%c0_12, %c0_13] : memref<8x1xf32, #tpu.memory_space<vmem>>, vector<8x1xf32>
    %c0_14 = arith.constant 0 : index
    %c0_15 = arith.constant 0 : index
    %29 = vector.load %arg6[%c0_14, %c0_15] : memref<8x1xf32, #tpu.memory_space<vmem>>, vector<8x1xf32>
    %c1_i32_16 = arith.constant 1 : i32
    %30 = tpu.dynamic_rotate %25 by %c1_i32_16 dim 1 : vector<1x256xf32>, i32 -> vector<1x256xf32>
    %cst = arith.constant 0.000000e+00 : f32
    %31 = vector.broadcast %cst : f32 to vector<1x256xf32>
    %32 = arith.select %21, %30, %31 : vector<1x256xi1>, vector<1x256xf32>
    %c255_i32_17 = arith.constant 255 : i32
    %33 = tpu.dynamic_rotate %24 by %c255_i32_17 dim 1 : vector<1x256xf32>, i32 -> vector<1x256xf32>
    %cst_18 = arith.constant 0.000000e+00 : f32
    %34 = vector.broadcast %cst_18 : f32 to vector<1x256xf32>
    %35 = arith.select %23, %33, %34 : vector<1x256xi1>, vector<1x256xf32>
    %cst_19 = arith.constant dense<0.000000e+00> : vector<8x256xf32>
    %36 = tpu.matmul %26, %32, %cst_19 {dimension_numbers = #tpu.dot_dimension_numbers<[1], [0], [0], [1], [0, 0, 1, 1], [], []>} : vector<8x1xf32>, vector<1x256xf32>, vector<8x256xf32> -> vector<8x256xf32>
    %cst_20 = arith.constant dense<0.000000e+00> : vector<8x256xf32>
    %37 = tpu.matmul %27, %24, %cst_20 {dimension_numbers = #tpu.dot_dimension_numbers<[1], [0], [0], [1], [0, 0, 1, 1], [], []>} : vector<8x1xf32>, vector<1x256xf32>, vector<8x256xf32> -> vector<8x256xf32>
    %38 = arith.addf %36, %37 : vector<8x256xf32>
    %cst_21 = arith.constant dense<0.000000e+00> : vector<8x256xf32>
    %39 = tpu.matmul %28, %25, %cst_21 {dimension_numbers = #tpu.dot_dimension_numbers<[1], [0], [0], [1], [0, 0, 1, 1], [], []>} : vector<8x1xf32>, vector<1x256xf32>, vector<8x256xf32> -> vector<8x256xf32>
    %40 = arith.addf %38, %39 : vector<8x256xf32>
    %41 = vector.broadcast %29 : vector<8x1xf32> to vector<8x256xf32>
    %42 = arith.addf %40, %41 : vector<8x256xf32>
    %cst_22 = arith.constant dense<0.000000e+00> : vector<8x256xf32>
    %43 = tpu.matmul %26, %24, %cst_22 {dimension_numbers = #tpu.dot_dimension_numbers<[1], [0], [0], [1], [0, 0, 1, 1], [], []>} : vector<8x1xf32>, vector<1x256xf32>, vector<8x256xf32> -> vector<8x256xf32>
    %cst_23 = arith.constant dense<0.000000e+00> : vector<8x256xf32>
    %44 = tpu.matmul %27, %25, %cst_23 {dimension_numbers = #tpu.dot_dimension_numbers<[1], [0], [0], [1], [0, 0, 1, 1], [], []>} : vector<8x1xf32>, vector<1x256xf32>, vector<8x256xf32> -> vector<8x256xf32>
    %45 = arith.addf %43, %44 : vector<8x256xf32>
    %cst_24 = arith.constant dense<0.000000e+00> : vector<8x256xf32>
    %46 = tpu.matmul %28, %35, %cst_24 {dimension_numbers = #tpu.dot_dimension_numbers<[1], [0], [0], [1], [0, 0, 1, 1], [], []>} : vector<8x1xf32>, vector<1x256xf32>, vector<8x256xf32> -> vector<8x256xf32>
    %47 = arith.addf %45, %46 : vector<8x256xf32>
    %48 = vector.broadcast %29 : vector<8x1xf32> to vector<8x256xf32>
    %49 = arith.addf %47, %48 : vector<8x256xf32>
    %cst_25 = arith.constant 0.000000e+00 : f32
    %50 = vector.broadcast %cst_25 : f32 to vector<8x256xf32>
    %51 = arith.cmpf ogt, %42, %50 : vector<8x256xf32>
    %cst_26 = arith.constant 0.00999999977 : f32
    %52 = vector.broadcast %cst_26 : f32 to vector<8x256xf32>
    %53 = arith.mulf %52, %42 : vector<8x256xf32>
    %54 = arith.select %51, %42, %53 : vector<8x256xi1>, vector<8x256xf32>
    %cst_27 = arith.constant 0.000000e+00 : f32
    %55 = vector.broadcast %cst_27 : f32 to vector<8x256xf32>
    %56 = arith.cmpf ogt, %49, %55 : vector<8x256xf32>
    %cst_28 = arith.constant 0.00999999977 : f32
    %57 = vector.broadcast %cst_28 : f32 to vector<8x256xf32>
    %58 = arith.mulf %57, %49 : vector<8x256xf32>
    %59 = arith.select %56, %49, %58 : vector<8x256xi1>, vector<8x256xf32>
    %c0_29 = arith.constant 0 : index
    %c0_30 = arith.constant 0 : index
    %60 = vector.load %arg7[%c0_29, %c0_30] : memref<8x256xf32, #tpu.memory_space<vmem>>, vector<8x256xf32>
    tpu.vector_store %arg7[%c0_29, %c0_30], %54 {strides = array<i32>} : memref<8x256xf32, #tpu.memory_space<vmem>>, vector<8x256xf32>,
    %c0_31 = arith.constant 0 : index
    %c0_32 = arith.constant 0 : index
    %61 = vector.load %arg8[%c0_31, %c0_32] : memref<8x256xf32, #tpu.memory_space<vmem>>, vector<8x256xf32>
    tpu.vector_store %arg8[%c0_31, %c0_32], %59 {strides = array<i32>} : memref<8x256xf32, #tpu.memory_space<vmem>>, vector<8x256xf32>,
    %62 = arith.maximumf %54, %59 : vector<8x256xf32>
    %c0_33 = arith.constant 0 : index
    %c0_34 = arith.constant 0 : index
    %63 = vector.load %arg9[%c0_33, %c0_34] : memref<8x256xf32, #tpu.memory_space<vmem>>, vector<8x256xf32>
    tpu.vector_store %arg9[%c0_33, %c0_34], %62 {strides = array<i32>} : memref<8x256xf32, #tpu.memory_space<vmem>>, vector<8x256xf32>,
    return
  }
  func.func @transform_0(%arg0: i32) -> (i32, i32) {
    %c0_i32 = arith.constant 0 : i32
    %c0_i32_0 = arith.constant 0 : i32
    return %c0_i32, %arg0 : i32, i32
  }
  func.func @transform_1(%arg0: i32) -> (i32, i32) {
    %c0_i32 = arith.constant 0 : i32
    %c0_i32_0 = arith.constant 0 : i32
    return %c0_i32, %arg0 : i32, i32
  }
  func.func @transform_2(%arg0: i32) -> (i32, i32) {
    %c0_i32 = arith.constant 0 : i32
    %c0_i32_0 = arith.constant 0 : i32
    %c0_i32_1 = arith.constant 0 : i32
    return %c0_i32, %c0_i32_0 : i32, i32
  }
  func.func @transform_3(%arg0: i32) -> (i32, i32) {
    %c0_i32 = arith.constant 0 : i32
    %c0_i32_0 = arith.constant 0 : i32
    %c0_i32_1 = arith.constant 0 : i32
    return %c0_i32, %c0_i32_0 : i32, i32
  }
  func.func @transform_4(%arg0: i32) -> (i32, i32) {
    %c0_i32 = arith.constant 0 : i32
    %c0_i32_0 = arith.constant 0 : i32
    %c0_i32_1 = arith.constant 0 : i32
    return %c0_i32, %c0_i32_0 : i32, i32
  }
  func.func @transform_5(%arg0: i32) -> (i32, i32) {
    %c0_i32 = arith.constant 0 : i32
    %c0_i32_0 = arith.constant 0 : i32
    %c0_i32_1 = arith.constant 0 : i32
    return %c0_i32, %c0_i32_0 : i32, i32
  }
  func.func @transform_6(%arg0: i32) -> (i32, i32) {
    %c0_i32 = arith.constant 0 : i32
    %c0_i32_0 = arith.constant 0 : i32
    return %c0_i32, %arg0 : i32, i32
  }
  func.func @transform_7(%arg0: i32) -> (i32, i32) {
    %c0_i32 = arith.constant 0 : i32
    %c0_i32_0 = arith.constant 0 : i32
    return %c0_i32, %arg0 : i32, i32
  }
  func.func @transform_8(%arg0: i32) -> (i32, i32) {
    %c0_i32 = arith.constant 0 : i32
    %c0_i32_0 = arith.constant 0 : i32
    return %c0_i32, %arg0 : i32, i32
  }
}

</mosaic_0001>

<bundles_post_ra>
// kernel: tpu_custom_call.1
= control target key start
LH: loop header
LB: loop body
LE: loop exit
PB: predicated region body
PF: predicated region fallthrough
CT: control target
= control target key end

     0   :  { %s1615_s0 = inlined_call_operand.vmem [shape: f32[1,512], index: 0, kind: input, shape index: {}]   ;;  %s1616_s1 = inlined_call_operand.vmem [shape: f32[1,512], index: 1, kind: input, shape index: {}]   ;;  %s1617_s2 = inlined_call_operand.vmem [shape: f32[8,1], index: 2, kind: input, shape index: {}]   ;;  %s1618_s3 = inlined_call_operand.vmem [shape: f32[8,1], index: 3, kind: input, shape index: {}]   ;;  %s1619_s4 = inlined_call_operand.vmem [shape: f32[8,1], index: 4, kind: input, shape index: {}]   ;;  %s1620_s5 = inlined_call_operand.vmem [shape: f32[8,1], index: 5, kind: input, shape index: {}]   ;;  %s1621_s6 = inlined_call_operand.hbm [shape: f32[8,512], index: 6, kind: output, shape index: {0}]   ;;  %s1622_s7 = inlined_call_operand.hbm [shape: f32[8,512], index: 7, kind: output, shape index: {1}]   ;;  %s1623_s8 = inlined_call_operand.hbm [shape: f32[8,512], index: 8, kind: output, shape index: {2}]  }
   0x1   :  { %1625 = sst [smem:[#allocation9_spill]] %s1615_s0 }
   0x2   :  { %1626 = sst [smem:[#allocation10_spill]] %s1616_s1 }
   0x3   :  { %14 = vsyncpa [#allocation3], 0 }
   0x4   :  { %16 = vsyncpa [#allocation3 + $0x1], 0 }
   0x5   :  { %17 = vsyncpa [#allocation5], 0 }
   0x6   :  { %19 = vsyncpa [#allocation5 + $0x1], 0  ;;  %s1361_s27 = smov 0   ;;  %s1363_s28 = smov 0  }
   0x7   :  { %s1365_s29 = smov 0   ;;  %s1367_s30 = smov 0  }
   0x8 LB: > { %s1382_s9 = sadd.s32 4294967295, %s1307_s30   ;;  %s1624_s10 = sadd.s32 4294967294, %s1307_s30   ;;  %s1307_s30 = sphi %s1367_s30, %s1637_s30   ;;  %s1303_s29 = sphi %s1365_s29, %s1636_s29   ;;  %s1299_s28 = sphi %s1363_s28, %s1635_s28   ;;  %s1295_s27 = sphi %s1361_s27, %s1634_s27  }
   0x9   : > { %s1386_s11 = sadd.s32 1, %s1307_s30   ;;  %s168_s12 = sadd.s32 1, %s1303_s29 }
   0xa   : > { %s165_s13 = ssub.s32 %s1307_s30, %s1386_s11  ;;  %p178_p0 = scmp.ne.s32.totalorder %s1303_s29, %s1299_s28 }
   0xb   : > { %p166_p1 = scmp.eq.s32.totalorder %s165_s13, 0  ;;  %p179_p2 = scmp.eq.s32.totalorder %s1382_s9, 1 }
   0xc   : > { %p184_p3 = scmp.ne.s32.totalorder %s1299_s28, %s1295_s27  ;;  %p185_p4 = scmp.eq.s32.totalorder %s1624_s10, 1 }
   0xd   : > { %s1399_s14 = scalar_select %p166_p1, %s1303_s29, %s168_s12  }
   0xe   : > { %p1401_p5 = por %p179_p2, %p178_p0  ;;  %p1405_p6 = por %p185_p4, %p184_p3 }
   0xf   : > { %p1096_p7 = scmp.ge.s32.totalorder %s1307_s30, 1  ;;  %p283_p8 = scmp.lt.s32.totalorder %s1307_s30, 3 }
  0x11   : > { %p284_p9 = pnand %p1096_p7, %p283_p8 }
  0x12   : > { %s1100_s17 = sshll.u32 (!%p284_p9), %s1382_s9, 1  ;;  %s1629_s1 = sld [smem:[#allocation10_spill]] (!%p284_p9) }
  0x13   : > { %287 = sbr.rel (%p284_p9) target bundleno = 419 (0x1a3), region = 44  ;;  %p331_p10 = scmp.lt.s32.totalorder (!%p284_p9), %s1100_s17, 3 }
  0x14   : > { %s1630_s0 = sld [smem:[#allocation9_spill]] (!%p284_p9)  ;;  %s1310_s24 = smov (!%p284_p9), 1  }
  0x15   : > { %s1311_s25 = smov (!%p284_p9), 127   ;;  %s1458_s22 = sshll.u32 (!%p284_p9), %s1382_s9, 8 }
  0x16   : > { %s1313_s13 = smov (!%p284_p9), [#allocation2]  }
  0x17   : > { %s1195_s10 = sshll.u32 (!%p284_p9), %s1313_s13, 4  ;;  %s1196_s10 = int_to_ptr.vmem [resolvable:$false] %s1195_s10 }
  0x18   : > { %v343_v0 = vlaneseq  ;;  %v1309_v1 = vmov 0.0   ;;  %s1639_s17 = smov (!%p331_p10, %s1100_s17), 3  ;;  %vm428_vm0 = vcmask 1040384   ;;  %v1428_v11 = vld [vmem:[%s1618_s3] sm:$0xff]  ;;  %vm424_vm1 = vcmask 7168   ;;  %s1197_s18 = scalar_lea.vmem %s1196_s10, 512 }
  0x19   : > { %497 = vmatprep.mubr.f32.mxu0 %v1309_v1  ;;  %577 = vmatprep.mubr.f32.mxu1 %v1309_v1  ;;  %s338_s20 = scalar_lea.vmem %s1629_s1, %s1639_s17  ;;  %v1440_v12 = vld [vmem:[%s1619_s4] sm:$0xff]  ;;  %v1312_v13 = vmov 0   ;;  %v347_v17 = vstv %s1458_s22 }
  0x1a   : > { %v386_v2 = vshrl.u32 %v343_v0, 7  ;;  %s333_s23 = scalar_lea.vmem %s1630_s0, %s1639_s17  ;;  %v379_v5 = vld [vmem:[%s338_s20] sm:$0x3]  ;;  %1190 = vset.pattern.permute.xlu0 %v1312_v13  ;;  %v344_v16 = vand.u32 127, %v343_v0  ;;  %s1488_s17 = scalar_lea.hbm %s1621_s6, %s1458_s22 }
  0x1b   : > { %v378_v6 = vld [vmem:[%s333_s23] sm:$0x3]  ;;  %s313_s23 = sand.u32 1, %s1299_s28  }
  0x1c   : > { %v387_v3 = vsub.s32 0, %v386_v2  ;;  %v391_v4 = vsub.s32 1, %v386_v2  ;;  %v383_v14 = vld [vmem:[%s1620_s5] sm:$0xff]  ;;  %v345_v18 = vadd.s32 128, %v344_v16  ;;  %v348_v19 = vadd.s32 %v347_v17, %v344_v16  ;;  %s915_s21 = scalar_lea.sflag [#allocation3], %s313_s23 }
  0x1d   : > { %v380_v15 = vld [vmem:[%s1617_s2] sm:$0xff]  ;;  %vm399_vm10 = vcmp.lt.s32.totalorder %v344_v16, 1  ;;  %vm419_vm11 = vcmp.lt.s32.totalorder %v344_v16, 127 }
  0x1e   : > { %v1420_v7 = vrot.slane %v379_v5, %v387_v3  ;;  %v408_v8 = vrot.slane %v378_v6, %v387_v3  ;;  %v412_v9 = vrot.slane %v378_v6, %v391_v4  ;;  %v1423_v10 = vrot.slane %v379_v5, %v391_v4 }
  0x1f   : > { %v349_v20 = vadd.s32 %v347_v17, %v345_v18  ;;  %v351_v21 = vsub.s32 0, %v348_v19  ;;  %vm350_vm2 = vcmp.lt.s32.totalorder %v348_v19, 0 }
  0x20   : > { %395 = vrot.lane.b32.xlu0 %v1420_v7, %s1310_s24  ;;  %415 = vrot.lane.b32.xlu1 %v408_v8, %s1311_s25 }
  0x21   : > { %1105 = vmatprep.subr.msk.mxu0 %vm428_vm0, %v412_v9  ;;  %v358_v22 = vsub.s32 0, %v349_v20  ;;  %v1103_v23 = vmin.u32 %v351_v21, %v348_v19  ;;  %vm357_vm3 = vcmp.lt.s32.totalorder %v349_v20, 0 }
  0x22   : > { %1106 = vmatpush1.msk.msra.mxu0 %vm428_vm0, %v408_v8 }
  0x23   : > { %1107 = vmatmul.mubr.msk.f32.vlgmr.msra.gmra.mxu0 %vm424_vm1, %v1428_v11  ;;  %1111 = vmatprep.subr.msk.mxu0 %vm428_vm0, %v1423_v10  ;;  %v1104_v24 = vmin.u32 %v358_v22, %v349_v20  ;;  %v354_v25 = vand.u32 255, %v1103_v23 }
  0x24   : > { %397 = vrot.lane.b32.xlu0 %v1423_v10, %s1310_s24  ;;  %417 = vrot.lane.b32.xlu1 %v412_v9, %s1311_s25  ;;  %s1481_s24 = sshll.u32 %s313_s23, 4 }
  0x25   : > { %1112 = vmatpush1.msk.msra.mxu0 %vm428_vm0, %v1420_v7  ;;  %655 = vmatprep.mubr.f32.mxu0 %v1309_v1  ;;  %v361_v26 = vand.u32 255, %v1104_v24  ;;  %v355_v27 = vsub.s32 0, %v354_v25  ;;  %s315_s25 = scalar_lea.vmem [#allocation2], %s1481_s24  ;;  %s1496_s19 = scalar_lea.vmem [#allocation4], %s1481_s24 }
  0x26   : > { %1117 = vmatprep.subr.msk.mxu0 %vm428_vm0, %v412_v9  ;;  %s939_s26 = sshll.u32 %s315_s25, 4  ;;  %s1490_s26 = int_to_ptr.vmem [resolvable:$true] %s939_s26 }
  0x27   : > { %1113 = vmatmul.mubr.msk.f32.vlgmr.msra.gmra.mxu0 %vm424_vm1, %v1440_v12  ;;  %v362_v28 = vsub.s32 0, %v361_v26  ;;  %v356_v29 = vsel %vm350_vm2, %v355_v27, %v354_v25  ;;  %s1191_s12 = scalar_lea.vmem %s1490_s26, 256  ;;  %p1198_p0 = scmp.lt.s32.totalorder %s1490_s26, %s1196_s10 }
  0x28   : > { %1118 = vmatpush1.msk.msra.mxu0 %vm428_vm0, %v408_v8  ;;  %806 = vmatprep.mubr.f32.mxu0 %v1309_v1  ;;  %vm364_vm4 = vcmp.ne.s32.totalorder %v356_v29, 0  ;;  %vm366_vm5 = vcmp.lt.s32.totalorder %v356_v29, 0  ;;  %v370_v31 = vadd.s32 256, %v356_v29  ;;  %p1192_p11 = scmp.ne.s32.totalorder %s1490_s26, %s1191_s12  ;;  %p1199_p1 = scmp.lt.s32.totalorder %s1197_s18, %s1191_s12 }
  0x29   : > { %666 = vperm.xlu0 %1190, %v383_v14   ;;  %v363_v30 = vsel %vm357_vm3, %v362_v28, %v361_v26  ;;  %vm368_vm8 = vmand %vm366_vm5, %vm364_vm4 }
  0x2a   : > { %vm365_vm6 = vcmp.ne.s32.totalorder %v363_v30, 0  ;;  %vm367_vm7 = vcmp.lt.s32.totalorder %v363_v30, 0  ;;  %v371_v32 = vadd.s32 256, %v363_v30  ;;  %v372_v35 = vsel %vm368_vm8, %v370_v31, %v356_v29  ;;  %p1193_p12 = pnand %p1192_p11, %p1401_p5  ;;  %p1200_p2 = por %p1199_p1, %p1198_p0 }
  0x2b   : > { %1119 = vmatmul.mubr.msk.f32.vlgmr.msra.gmra.mxu0 %vm424_vm1, %v380_v15  ;;  %vm369_vm9 = vmand %vm367_vm7, %vm365_vm6  ;;  %vm374_vm13 = vcmp.ne.s32.totalorder %v372_v35, 0  ;;  %vm376_vm15 = vcmp.ne.s32.totalorder %v372_v35, 255 }
  0x2c   : > { %v373_v36 = vsel %vm369_vm9, %v371_v32, %v363_v30  ;;  %p1194_p13 = pneg %p1193_p12 }
  0x2d   : > { %vm375_vm12 = vcmp.ne.s32.totalorder %v373_v36, 0  ;;  %vm377_vm14 = vcmp.ne.s32.totalorder %v373_v36, 255 }
  0x2e   : > { %p1201_p3 = pnand %p1200_p2, %p1194_p13 }
  0x92   : > { %v396_v33 = vpop.permute.xlu0 %395  ;;  %v416_v34 = vpop.permute.xlu1 %415 }
  0x96   : > { %v398_v37 = vpop.permute.xlu0 %397  ;;  %v418_v38 = vpop.permute.xlu1 %417 }
  0x97   : > { %v401_v39 = vsel %vm399_vm10, %v398_v37, %v396_v33  ;;  %v421_v40 = vsel %vm419_vm11, %v418_v38, %v416_v34  ;;  %v400_v41 = vsel %vm399_vm10, %v396_v33, %v398_v37  ;;  %v420_v45 = vsel %vm419_vm11, %v416_v34, %v418_v38 }
  0x98   : > { %v403_v42 = vsel %vm375_vm12, %v400_v41, 0.0  ;;  %v402_v43 = vsel %vm374_vm13, %v401_v39, 0.0  ;;  %v423_v44 = vsel %vm377_vm14, %v421_v40, 0.0  ;;  %v422_v46 = vsel %vm376_vm15, %v420_v45, 0.0 }
  0x99   : > { %1108 = vmatprep.subr.msk.mxu1 %vm428_vm0, %v403_v42 }
  0x9a   : > { %1109 = vmatpush1.msk.msra.mxu1 %vm428_vm0, %v402_v43 }
  0x9b   : > { %1110 = vmatmul.mubr.msk.f32.vlgmr.msra.gmra.mxu1 %vm424_vm1, %v380_v15  ;;  %1114 = vmatprep.subr.msk.mxu1 %vm428_vm0, %v1423_v10 }
  0x9c   : > { %1115 = vmatpush1.msk.msra.mxu1 %vm428_vm0, %v1420_v7  ;;  %735 = vmatprep.mubr.f32.mxu1 %v1309_v1 }
  0x9d   : > { %1120 = vmatprep.subr.msk.mxu1 %vm428_vm0, %v423_v44 }
  0x9f   : > { %1116 = vmatmul.mubr.msk.f32.vlgmr.msra.gmra.mxu1 %vm424_vm1, %v1428_v11 }
  0xa0   : > { %1121 = vmatpush1.msk.msra.mxu1 %vm428_vm0, %v422_v46  ;;  %883 = vmatprep.mubr.f32.mxu1 %v1309_v1 }
  0xa3   : > { %1122 = vmatmul.mubr.msk.f32.vlgmr.msra.gmra.mxu1 %vm424_vm1, %v1440_v12 }
  0xa4   : > { %v667_v55 = vpop.permute.xlu0 %666 }
  0xe3   : > { %v499_v47 = vpop.f32.mrf.mxu0 }
  0xe5   : > { %v501_v48 = vpop.f32.mrf.mxu0 }
  0xe7   : > { %v657_v49 = vpop.f32.mrf.mxu0 }
  0xe9   : > { %v659_v50 = vpop.f32.mrf.mxu0 }
  0xeb   : > { %v808_v53 = vpop.f32.mrf.mxu0 }
  0xed   : > { %v810_v61 = vpop.f32.mrf.mxu0 }
 0x15b   : > { %v579_v51 = vpop.f32.mrf.mxu1 }
 0x15c   : > { %v580_v52 = vadd.f32 %v579_v51, %v499_v47 }
 0x15d   : > { %v581_v54 = vpop.f32.mrf.mxu1 }
 0x15e   : > { %v662_v56 = vadd.f32 %v657_v49, %v580_v52  ;;  %v582_v57 = vadd.f32 %v581_v54, %v501_v48 }
 0x15f   : > { %v737_v58 = vpop.f32.mrf.mxu1 }
 0x160   : > { %v663_v59 = vadd.f32 %v659_v50, %v582_v57  ;;  %v669_v60 = vadd.f32 %v667_v55, %v662_v56  ;;  %v809_v1 = vadd.f32 %v808_v53, %v737_v58 }
 0x161   : > { %v739_v62 = vpop.f32.mrf.mxu1 }
 0x162   : > { %v670_v63 = vadd.f32 %v667_v55, %v663_v59  ;;  %vm894_vm0 = vcmp.gt.f32.partialorder %v669_v60, 0.0  ;;  %v896_v0 = vmul.f32 0.01, %v669_v60  ;;  %v811_v2 = vadd.f32 %v810_v61, %v739_v62 }
 0x163   : > { %v885_v3 = vpop.f32.mrf.mxu1 }
 0x164   : > { %vm895_vm1 = vcmp.gt.f32.partialorder %v670_v63, 0.0  ;;  %v897_v4 = vmul.f32 0.01, %v670_v63  ;;  %v890_v5 = vadd.f32 %v885_v3, %v809_v1  ;;  %v898_v6 = vsel %vm894_vm0, %v669_v60, %v896_v0 }
 0x165   : > { %v887_v7 = vpop.f32.mrf.mxu1  ;;  %906 = vst [vmem:[%s315_s25] sm:$0xff] %v898_v6 }
 0x166   : > { %v892_v8 = vadd.f32 %v890_v5, %v667_v55  ;;  %v891_v9 = vadd.f32 %v887_v7, %v811_v2  ;;  %v1493_v10 = vsel %vm895_vm1, %v670_v63, %v897_v4 }
 0x167   : > { %907 = vst [vmem:[%s315_s25 + $0x8] sm:$0xff] %v1493_v10 }
 0x168   : > { %vm900_vm2 = vcmp.gt.f32.partialorder %v892_v8, 0.0  ;;  %v902_v11 = vmul.f32 0.01, %v892_v8  ;;  %v893_v12 = vadd.f32 %v891_v9, %v667_v55 }
 0x169   : > { %1204 = shalt.err (!%p1201_p3)
}
 0x16a   : > { %s1205_s25 = scalar_lea.hbm %s1488_s17, 256  ;;  %s1209_s13 = scalar_lea.hbm %s1621_s6, 512 }
 0x16b   : > { %p1206_p4 = scmp.ne.s32.totalorder %s1488_s17, %s1205_s25  ;;  %p1210_p9 = scmp.lt.s32.totalorder %s1488_s17, %s1621_s6 }
 0x16c   : > { %p1211_p10 = scmp.lt.s32.totalorder %s1209_s13, %s1205_s25 }
 0x16d   : > { %p1207_p7 = pnand %p1206_p4, %p1401_p5 }
 0x16e   : > { %p1212_p11 = por %p1211_p10, %p1210_p9 }
 0x16f   : > { %p1208_p8 = pneg %p1207_p7 }
 0x171   : > { %p1213_p12 = pnand %p1212_p11, %p1208_p8 }
 0x173   : > { %1216 = shalt.err (!%p1213_p12)
}
 0x174   : > { %1137 = dma.vmem_to_hbm [thread:$0]  (%p1401_p5), %s1490_s26, 256, %s1488_s17, %s915_s21   ;;  %vm901_vm3 = vcmp.gt.f32.partialorder %v893_v12, 0.0  ;;  %v903_v13 = vmul.f32 0.01, %v893_v12  ;;  %v904_v14 = vsel %vm900_vm2, %v892_v8, %v902_v11 }
 0x175   : > { %s1527_s10 = scalar_lea.hbm %s1622_s7, %s1458_s22  ;;  %s1530_s18 = scalar_lea.vmem [#allocation6], %s1481_s24  ;;  %908 = vst [vmem:[%s1496_s19] sm:$0xff] %v904_v14  ;;  %v910_v15 = vmax.f32 %v898_v6, %v904_v14 }
 0x176   : > { %s967_s20 = sshll.u32 %s1530_s18, 4  ;;  %s1631_s12 = sshll.u32 %s1496_s19, 4  ;;  %v905_v16 = vsel %vm901_vm3, %v893_v12, %v903_v13  ;;  %s1536_s12 = int_to_ptr.vmem [resolvable:$true] %s1631_s12  ;;  %s1547_s20 = int_to_ptr.vmem [resolvable:$true] %s967_s20 }
 0x177   : > { %909 = vst [vmem:[%s1496_s19 + $0x8] sm:$0xff] %v905_v16  ;;  %v911_v17 = vmax.f32 %v1493_v10, %v905_v16  ;;  %912 = vst [vmem:[%s1530_s18] sm:$0xff] %v910_v15  ;;  %s1545_s24 = scalar_lea.hbm %s1623_s8, %s1458_s22  ;;  %s1632_s21 = sand.u32 1, %s1382_s9  }
 0x178   : > { %s1551_s25 = scalar_lea.sflag [#allocation5], %s1632_s21  ;;  %s1217_s23 = scalar_lea.vmem %s1536_s12, 256 }
 0x179   : > { %p1218_p13 = scmp.ne.s32.totalorder %s1536_s12, %s1217_s23  ;;  %s1314_s13 = smov [#allocation4]  }
 0x17a   : > { %s1221_s19 = sshll.u32 %s1314_s13, 4  ;;  %s1222_s19 = int_to_ptr.vmem [resolvable:$false] %s1221_s19 }
 0x17b   : > { %p1219_p0 = pnand %p1218_p13, %p1401_p5  ;;  %s1223_s0 = scalar_lea.vmem %s1222_s19, 512 }
 0x17c   : > { %p1224_p2 = scmp.lt.s32.totalorder %s1536_s12, %s1222_s19  ;;  %p1225_p3 = scmp.lt.s32.totalorder %s1223_s0, %s1217_s23 }
 0x17d   : > { %p1220_p1 = pneg %p1219_p0 }
 0x17e   : > { %p1226_p4 = por %p1225_p3, %p1224_p2 }
 0x180   : > { %p1227_p7 = pnand %p1226_p4, %p1220_p1 }
 0x182   : > { %1230 = shalt.err (!%p1227_p7)
}
 0x183   : > { %s1231_s9 = scalar_lea.hbm %s1527_s10, 256  ;;  %s1235_s26 = scalar_lea.hbm %s1622_s7, 512 }
 0x184   : > { %p1232_p8 = scmp.ne.s32.totalorder %s1527_s10, %s1231_s9  ;;  %p1236_p11 = scmp.lt.s32.totalorder %s1527_s10, %s1622_s7 }
 0x185   : > { %p1237_p12 = scmp.lt.s32.totalorder %s1235_s26, %s1231_s9 }
 0x186   : > { %p1233_p9 = pnand %p1232_p8, %p1401_p5 }
 0x187   : > { %p1238_p13 = por %p1237_p12, %p1236_p11 }
 0x188   : > { %p1234_p10 = pneg %p1233_p9 }
 0x18a   : > { %p1239_p0 = pnand %p1238_p13, %p1234_p10 }
 0x18c   : > { %1242 = shalt.err (!%p1239_p0)
}
 0x18d   : > { %1138 = dma.vmem_to_hbm [thread:$0]  (%p1401_p5), %s1536_s12, 256, %s1527_s10, %s1551_s25   ;;  %913 = vst [vmem:[%s1530_s18 + $0x8] sm:$0xff] %v911_v17 }
 0x18e   : > { %s1243_s23 = scalar_lea.vmem %s1547_s20, 256  ;;  %s1315_s13 = smov [#allocation6]  }
 0x18f   : > { %p1244_p1 = scmp.ne.s32.totalorder %s1547_s20, %s1243_s23  ;;  %s1247_s19 = sshll.u32 %s1315_s13, 4  ;;  %s1248_s19 = int_to_ptr.vmem [resolvable:$false] %s1247_s19 }
 0x190   : > { %s1249_s0 = scalar_lea.vmem %s1248_s19, 512  ;;  %p1250_p4 = scmp.lt.s32.totalorder %s1547_s20, %s1248_s19 }
 0x191   : > { %p1245_p2 = pnand %p1244_p1, %p1401_p5  ;;  %p1251_p7 = scmp.lt.s32.totalorder %s1249_s0, %s1243_s23 }
 0x193   : > { %p1246_p3 = pneg %p1245_p2  ;;  %p1252_p8 = por %p1251_p7, %p1250_p4 }
 0x195   : > { %p1253_p9 = pnand %p1252_p8, %p1246_p3 }
 0x197   : > { %1256 = shalt.err (!%p1253_p9)
}
 0x198   : > { %s1257_s10 = scalar_lea.hbm %s1545_s24, 256  ;;  %s1261_s9 = scalar_lea.hbm %s1623_s8, 512 }
 0x199   : > { %p1258_p10 = scmp.ne.s32.totalorder %s1545_s24, %s1257_s10  ;;  %p1262_p13 = scmp.lt.s32.totalorder %s1545_s24, %s1623_s8 }
 0x19a   : > { %p1263_p0 = scmp.lt.s32.totalorder %s1261_s9, %s1257_s10 }
 0x19b   : > { %p1259_p11 = pnand %p1258_p10, %p1401_p5 }
 0x19c   : > { %p1264_p1 = por %p1263_p0, %p1262_p13 }
 0x19d   : > { %p1260_p12 = pneg %p1259_p11 }
 0x19f   : > { %p1265_p2 = pnand %p1264_p1, %p1260_p12 }
 0x1a1   : > { %1268 = shalt.err (!%p1265_p2)
}
 0x1a2   : > { %1139 = dma.vmem_to_hbm [thread:$0]  (%p1401_p5), %s1547_s20, 256, %s1545_s24, %s1551_s25  }
 0x1a3 PF: > { %p1153_p3 = scmp.ge.s32.totalorder %s1307_s30, 2  ;;  %s979_s26 = sand.u32 1, %s1295_s27  }
 0x1a4   : > { %s980_s17 = scalar_lea.sflag [#allocation3], %s979_s26 }
 0x1a5   : > { %p1144_p4 = pnand %p1153_p3, %p1405_p6 }
 0x1a7   : > { %p1145_p7 = pneg %p1144_p4 }
 0x1a9   : > { %1286 = dma.done.wait (%p1145_p7), %s980_s17, 256  }
 0x1aa   : > { %1288 = vsyncadd (%p1145_p7), %s980_s17, 4294967040  ;;  %s1633_s21 = sadd.s32 4294967294, %s1307_s30  }
 0x1ab   : > { %s988_s23 = sand.u32 1, %s1633_s21  }
 0x1ac   : > { %s989_s15 = scalar_lea.sflag [#allocation5], %s988_s23 }
 0x1ad   : > { %1290 = dma.done.wait (%p1145_p7), %s989_s15, 512  }
 0x1ae   : > { %1292 = vsyncadd (%p1145_p7), %s989_s15, 4294966784  ;;  %p22_p5 = scmp.ge.s32.totalorder %s1386_s11, 4   ;;  %s1634_s27 = smov %s1299_s28 }
 0x1af   : > { %s1635_s28 = smov %s1303_s29  ;;  %s1636_s29 = smov %s1399_s14 }
 0x1b0   : > { %s1637_s30 = smov %s1386_s11  ;;  %24 = sbr.rel (!%p22_p5) target bundleno = 8 (0x8), region = 114 }
 0x1b5   :  { %1003 = vsyncpa [#allocation3], 1 }
 0x1b6   :  { %1005 = vsyncpa [#allocation3 + $0x1], 1 }
 0x1b7   :  { %1006 = vsyncpa [#allocation5], 1 }
 0x1b8   :  { %1008 = vsyncpa [#allocation5 + $0x1], 1 }

</bundles_post_ra>
